<compile_context>
chip_gen: v7x
topology: tpu7x:2x2x1
jax: 0.10.0
libtpu: 0.0.40
codegen_flags: <defaults>
</compile_context>

<pallas_src>
import functools

import jax
import jax.numpy as jnp
import numpy as np
from jax import lax
from jax.experimental import pallas as pl
from jax.experimental.pallas import tpu as pltpu

GN_GROUPS = 32
GN_EPS = 1e-5


def _group_mask(c: int, groups: int) -> jnp.ndarray:
    """Symmetric (c, c) matrix M with M[i, j] = 1/group_size iff same group."""
    gsz = c // groups
    gid = np.arange(c) // gsz
    m = (gid[:, None] == gid[None, :]).astype(np.float32) / np.float32(gsz)
    return jnp.asarray(m)


def fsm_kernel(x_ref, waT_ref, ba_ref, g1w_ref, g1b_ref,
               wc_ref, bc_ref, g2w_ref, g2b_ref, m1_ref, m2_ref,
               o_ref, *, hw: int):
    x = x_ref[...]                                   # (B_t, C_in, HW), x.dtype
    inv_hw = 1.0 / hw

    # --- 1. global average pool over the spatial (lane) axis ----------------
    # f32-accumulating reduction; does NOT materialize an f32 copy of x.
    pooled = jnp.sum(x, axis=2, dtype=jnp.float32) * inv_hw        # (B_t, C_in)

    # --- 2. 1x1 conv_atten for the whole batch tile (one small matmul) ------
    att = jnp.dot(pooled, waT_ref[...],
                  preferred_element_type=jnp.float32) + ba_ref[...]  # (B_t, C_in)

    # --- 3. GroupNorm(32, C_in) on the pooled vector (spatial size 1x1) -----
    # NOTE: E[x^2]-E[x]^2 in f32; cancellation-prone only for |mean| >> std.
    m1 = m1_ref[...]
    gmean = jnp.dot(att, m1, preferred_element_type=jnp.float32)
    gmsq = jnp.dot(att * att, m1, preferred_element_type=jnp.float32)
    gvar = gmsq - gmean * gmean
    att = (att - gmean) * lax.rsqrt(gvar + GN_EPS)
    att = att * g1w_ref[...] + g1b_ref[...]

    # --- 4. sigmoid attention; x + x*atten == x * (1 + atten) ---------------
    scale = 1.0 + jax.nn.sigmoid(att)                              # (B_t, C_in)

    # --- 5. fold the channel scale into the conv weight (tiny multiply) -----
    w_scaled = wc_ref[...][None, :, :] * scale[:, None, :]         # f32
    w_mm = w_scaled.astype(x.dtype)                                # MXU operand

    # --- 6. hot matmul: (B_t, C_out, C_in) @ (B_t, C_in, HW) ----------------
    y = jnp.einsum('boc,bcl->bol', w_mm, x,
                   preferred_element_type=jnp.float32)             # f32

    # --- 7. GroupNorm(32, C_out); conv bias + GN affine folded into one FMA -
    bc = bc_ref[...]                                               # (1, C_out)
    # Analytic per-channel mean: sum_l(w @ x) == w @ sum_l(x)  (saves one full
    # lane reduction over the big y tile).
    w_f32 = w_mm.astype(jnp.float32)                               # tiny
    cmean_raw = jnp.sum(w_f32 * pooled[:, None, :], axis=2)        # (B_t, C_out)
    cmsq_raw = jnp.sum(y * y, axis=2) * inv_hw
    cmean = cmean_raw + bc                                         # stats of y+bc
    cmsq = cmsq_raw + 2.0 * bc * cmean_raw + bc * bc
    m2 = m2_ref[...]
    gmean2 = jnp.dot(cmean, m2, preferred_element_type=jnp.float32)
    gmsq2 = jnp.dot(cmsq, m2, preferred_element_type=jnp.float32)
    gvar2 = gmsq2 - gmean2 * gmean2
    s = g2w_ref[...] * lax.rsqrt(gvar2 + GN_EPS)                   # (B_t, C_out)
    t = (bc - gmean2) * s + g2b_ref[...]
    o_ref[...] = (y * s[:, :, None] + t[:, :, None]).astype(o_ref.dtype)


def _pick_batch_tile(n, c_in, c_out, hw, in_bytes, out_bytes, target_bytes):
    """Largest divisor of n (capped at n//2 so the grid has >= 2 'parallel'
    steps for v7x's two TensorCores) whose real per-step footprint —
    double-buffered x/out blocks plus the f32 y and y*y temporaries — stays
    under target_bytes."""
    def step_bytes(bt):
        x_blk = bt * c_in * hw * in_bytes
        o_blk = bt * c_out * hw * out_bytes
        temps = 2 * bt * c_out * hw * 4          # f32 y + y*y temporary
        return 2 * (x_blk + o_blk) + temps
    bt_cap = n if n < 2 else n // 2
    best = 1
    for bt in range(1, bt_cap + 1):
        if n % bt == 0 and step_bytes(bt) <= target_bytes:
            best = bt
    return best


@functools.partial(jax.jit, static_argnames=("out_dtype",))
def feature_selection_module(x_nchw, wa, ba, g1w, g1b, wc, bc, g2w, g2b,
                             out_dtype=None):
    n, c_in, h, w = x_nchw.shape
    c_out = wc.shape[0]
    assert c_in % GN_GROUPS == 0 and c_out % GN_GROUPS == 0, \
        "GroupNorm(32, C) requires C % 32 == 0"
    hw = h * w
    out_dtype = x_nchw.dtype if out_dtype is None else jnp.dtype(out_dtype)

    # Free metadata reshape only — no astype / pad / crop HBM passes.
    x = x_nchw.reshape(n, c_in, hw)

    in_bytes = jnp.dtype(x.dtype).itemsize
    out_bytes = jnp.dtype(out_dtype).itemsize

    # Generation-aware VMEM budgeting.
    try:
        vmem_cap = int(pltpu.get_tpu_info().vmem_capacity_bytes)
    except Exception:
        vmem_cap = 64 * 2**20                    # conservative (v7x-sized)
    if vmem_cap >= 96 * 2**20:                   # v5e / v6e: 128 MiB physical
        vmem_limit_cap = 100 * 2**20
        tile_target = 16 * 2**20
    else:                                        # v7x: 64 MiB physical
        vmem_limit_cap = 52 * 2**20
        tile_target = 12 * 2**20

    bt = _pick_batch_tile(n, c_in, c_out, hw, in_bytes, out_bytes, tile_target)

    row = lambda v: jnp.asarray(v, jnp.float32).reshape(1, -1)
    consts = (
        jnp.asarray(wa, jnp.float32).T,          # (C_in, C_in), pre-transposed
        row(ba), row(g1w), row(g1b),
        jnp.asarray(wc, jnp.float32),            # (C_out, C_in)
        row(bc), row(g2w), row(g2b),
        _group_mask(c_in, GN_GROUPS),            # (C_in, C_in)
        _group_mask(c_out, GN_GROUPS),           # (C_out, C_out)
    )

    def const_spec(arr):
        nd = arr.ndim
        return pl.BlockSpec(arr.shape, lambda i, _nd=nd: (0,) * _nd)

    const_bytes = sum(int(np.prod(a.shape)) * 4 for a in consts)
    step_need = (2 * (bt * c_in * hw * in_bytes + bt * c_out * hw * out_bytes)
                 + 2 * bt * c_out * hw * 4 + 2 * const_bytes + 2 * 2**20)
    vmem_limit = int(min(vmem_limit_cap, max(24 * 2**20, step_need)))

    # TODO(synk): for very large feature maps (e.g. C=256, HW=128*128) add a
    # second grid axis over HW with accumulator-based two-pass GroupNorm-2
    # stats so per-step blocks fit v7x's 64 MiB VMEM; unnecessary here.
    out = pl.pallas_call(
        functools.partial(fsm_kernel, hw=hw),
        out_shape=jax.ShapeDtypeStruct((n, c_out, hw), out_dtype),
        grid_spec=pltpu.PrefetchScalarGridSpec(
            num_scalar_prefetch=0,
            grid=(n // bt,),
            in_specs=[pl.BlockSpec((bt, c_in, hw), lambda i: (i, 0, 0))]
                     + [const_spec(a) for a in consts],
            out_specs=pl.BlockSpec((bt, c_out, hw), lambda i: (i, 0, 0)),
        ),
        compiler_params=pltpu.CompilerParams(
            dimension_semantics=("parallel",),
            vmem_limit_bytes=vmem_limit),
    )(x, *consts)

    return out.reshape(n, c_out, h, w)


# ----------------------------- pure-JAX reference ----------------------------
def _group_norm_ref(x, groups, w, b, eps=GN_EPS):
    n, c, h, wd = x.shape
    xg = x.reshape(n, groups, c // groups, h, wd)
    mean = xg.mean(axis=(2, 3, 4), keepdims=True)
    var = xg.var(axis=(2, 3, 4), keepdims=True)
    xn = ((xg - mean) / jnp.sqrt(var + eps)).reshape(n, c, h, wd)
    return xn * w[None, :, None, None] + b[None, :, None, None]


def _reference(x, wa, ba, g1w, g1b, wc, bc, g2w, g2b):
    pooled = jnp.mean(x, axis=(2, 3), keepdims=True)
    att = jnp.einsum('oc,nchw->nohw', wa, pooled) + ba[None, :, None, None]
    att = jax.nn.sigmoid(_group_norm_ref(att, GN_GROUPS, g1w, g1b))
    x2 = x + x * att
    y = jnp.einsum('oc,nchw->nohw', wc, x2) + bc[None, :, None, None]
    return _group_norm_ref(y, GN_GROUPS, g2w, g2b)


# ------------------------------------ main ------------------------------------
if __name__ == "__main__":
    # GroupNorm(32, C) requires C % 32 == 0, so the smallest sensible channels
    # are 64 -> 32.
    N, C_IN, C_OUT, H, W = 2, 64, 32, 16, 16

    key = jax.random.PRNGKey(0)
    kx, kwa, kba, kwc, kbc, kg1w, kg1b, kg2w, kg2b = jax.random.split(key, 9)

    x = jax.random.normal(kx, (N, C_IN, H, W), dtype=jnp.float32)

    # conv_atten: 1x1 conv C_IN -> C_IN, xavier-uniform weight, PyTorch-style bias
    lim_a = float(np.sqrt(6.0 / (C_IN + C_IN)))
    wa = jax.random.uniform(kwa, (C_IN, C_IN), jnp.float32, -lim_a, lim_a)
    ba = jax.random.uniform(kba, (C_IN,), jnp.float32,
                            -1.0 / np.sqrt(C_IN), 1.0 / np.sqrt(C_IN))
    # conv: 1x1 conv C_IN -> C_OUT
    lim_c = float(np.sqrt(6.0 / (C_IN + C_OUT)))
    wc = jax.random.uniform(kwc, (C_OUT, C_IN), jnp.float32, -lim_c, lim_c)
    bc = jax.random.uniform(kbc, (C_OUT,), jnp.float32,
                            -1.0 / np.sqrt(C_IN), 1.0 / np.sqrt(C_IN))
    # GroupNorm affine params (non-trivial so the path is tested)
    g1w = 1.0 + 0.1 * jax.random.normal(kg1w, (C_IN,), jnp.float32)
    g1b = 0.1 * jax.random.normal(kg1b, (C_IN,), jnp.float32)
    g2w = 1.0 + 0.1 * jax.random.normal(kg2w, (C_OUT,), jnp.float32)
    g2b = 0.1 * jax.random.normal(kg2b, (C_OUT,), jnp.float32)

    ref = _reference(x, wa, ba, g1w, g1b, wc, bc, g2w, g2b)

    # f32 path: tight check against the pure-JAX reference.
    out = feature_selection_module(x, wa, ba, g1w, g1b, wc, bc, g2w, g2b)
    out = jax.block_until_ready(out)
    np.testing.assert_allclose(np.asarray(out), np.asarray(ref),
                               rtol=1e-4, atol=1e-4)

    # bf16 fast path: producer supplies bf16 activations; kernel reads bf16 from
    # HBM, uses the fast MXU path, and writes bf16 output (stats stay f32).
    x_bf16 = x.astype(jnp.bfloat16)
    out_bf16 = feature_selection_module(x_bf16, wa, ba, g1w, g1b, wc, bc,
                                        g2w, g2b)
    out_bf16 = jax.block_until_ready(out_bf16)
    assert out_bf16.dtype == jnp.bfloat16
    np.testing.assert_allclose(np.asarray(out_bf16, dtype=np.float32),
                               np.asarray(ref), rtol=5e-2, atol=5e-2)

    print("KERNEL_OK")
</pallas_src>

<mosaic_0001>
module attributes {stable_mosaic.version = 11 : i64} {
  func.func @fsm_kernel(%arg0: i32, %arg1: memref<1x64x256xf32, #tpu.memory_space<vmem>>, %arg2: memref<64x64xf32, #tpu.memory_space<vmem>>, %arg3: memref<1x64xf32, #tpu.memory_space<vmem>>, %arg4: memref<1x64xf32, #tpu.memory_space<vmem>>, %arg5: memref<1x64xf32, #tpu.memory_space<vmem>>, %arg6: memref<32x64xf32, #tpu.memory_space<vmem>>, %arg7: memref<1x32xf32, #tpu.memory_space<vmem>>, %arg8: memref<1x32xf32, #tpu.memory_space<vmem>>, %arg9: memref<1x32xf32, #tpu.memory_space<vmem>>, %arg10: memref<64x64xf32, #tpu.memory_space<vmem>>, %arg11: memref<32x32xf32, #tpu.memory_space<vmem>>, %arg12: memref<1x32x256xf32, #tpu.memory_space<vmem>>) attributes {dimension_semantics = [#tpu.dimension_semantics<parallel>], iteration_bounds = array<i64: 2>, scalar_prefetch = 0 : i64, scratch_operands = 0 : i64, tpu.core_type = #tpu.core_type<tc>, window_params = [{transform_indices = @transform_0, window_bounds = array<i64: 1, 64, 256>}, {pipeline_mode = #tpu.pipeline_mode<synchronous>, transform_indices = @transform_1, window_bounds = array<i64: 64, 64>}, {pipeline_mode = #tpu.pipeline_mode<synchronous>, transform_indices = @transform_2, window_bounds = array<i64: 1, 64>}, {pipeline_mode = #tpu.pipeline_mode<synchronous>, transform_indices = @transform_3, window_bounds = array<i64: 1, 64>}, {pipeline_mode = #tpu.pipeline_mode<synchronous>, transform_indices = @transform_4, window_bounds = array<i64: 1, 64>}, {pipeline_mode = #tpu.pipeline_mode<synchronous>, transform_indices = @transform_5, window_bounds = array<i64: 32, 64>}, {pipeline_mode = #tpu.pipeline_mode<synchronous>, transform_indices = @transform_6, window_bounds = array<i64: 1, 32>}, {pipeline_mode = #tpu.pipeline_mode<synchronous>, transform_indices = @transform_7, window_bounds = array<i64: 1, 32>}, {pipeline_mode = #tpu.pipeline_mode<synchronous>, transform_indices = @transform_8, window_bounds = array<i64: 1, 32>}, {pipeline_mode = #tpu.pipeline_mode<synchronous>, transform_indices = @transform_9, window_bounds = array<i64: 64, 64>}, {pipeline_mode = #tpu.pipeline_mode<synchronous>, transform_indices = @transform_10, window_bounds = array<i64: 32, 32>}, {transform_indices = @transform_11, window_bounds = array<i64: 1, 32, 256>}]} {
    %c0 = arith.constant 0 : index
    %c0_0 = arith.constant 0 : index
    %c0_1 = arith.constant 0 : index
    %0 = vector.load %arg1[%c0, %c0_0, %c0_1] : memref<1x64x256xf32, #tpu.memory_space<vmem>>, vector<1x64x256xf32>
    %cst = arith.constant dense<0.000000e+00> : vector<1x64xf32>
    %1 = vector.multi_reduction <add>, %0, %cst [2] : vector<1x64x256xf32> to vector<1x64xf32>
    %cst_2 = arith.constant 3.906250e-03 : f32
    %2 = vector.broadcast %cst_2 : f32 to vector<1x64xf32>
    %3 = arith.mulf %1, %2 : vector<1x64xf32>
    %c0_3 = arith.constant 0 : index
    %c0_4 = arith.constant 0 : index
    %4 = vector.load %arg2[%c0_3, %c0_4] : memref<64x64xf32, #tpu.memory_space<vmem>>, vector<64x64xf32>
    %cst_5 = arith.constant dense<0.000000e+00> : vector<1x64xf32>
    %5 = tpu.matmul %3, %4, %cst_5 {dimension_numbers = #tpu.dot_dimension_numbers<[1], [0], [0], [1], [0, 0, 1, 1], [], []>} : vector<1x64xf32>, vector<64x64xf32>, vector<1x64xf32> -> vector<1x64xf32>
    %c0_6 = arith.constant 0 : index
    %c0_7 = arith.constant 0 : index
    %6 = vector.load %arg3[%c0_6, %c0_7] : memref<1x64xf32, #tpu.memory_space<vmem>>, vector<1x64xf32>
    %7 = arith.addf %5, %6 : vector<1x64xf32>
    %c0_8 = arith.constant 0 : index
    %c0_9 = arith.constant 0 : index
    %8 = vector.load %arg10[%c0_8, %c0_9] : memref<64x64xf32, #tpu.memory_space<vmem>>, vector<64x64xf32>
    %cst_10 = arith.constant dense<0.000000e+00> : vector<1x64xf32>
    %9 = tpu.matmul %7, %8, %cst_10 {dimension_numbers = #tpu.dot_dimension_numbers<[1], [0], [0], [1], [0, 0, 1, 1], [], []>} : vector<1x64xf32>, vector<64x64xf32>, vector<1x64xf32> -> vector<1x64xf32>
    %10 = arith.mulf %7, %7 : vector<1x64xf32>
    %cst_11 = arith.constant dense<0.000000e+00> : vector<1x64xf32>
    %11 = tpu.matmul %10, %8, %cst_11 {dimension_numbers = #tpu.dot_dimension_numbers<[1], [0], [0], [1], [0, 0, 1, 1], [], []>} : vector<1x64xf32>, vector<64x64xf32>, vector<1x64xf32> -> vector<1x64xf32>
    %12 = arith.mulf %9, %9 : vector<1x64xf32>
    %13 = arith.subf %11, %12 : vector<1x64xf32>
    %14 = arith.subf %7, %9 : vector<1x64xf32>
    %cst_12 = arith.constant 9.99999974E-6 : f32
    %15 = vector.broadcast %cst_12 : f32 to vector<1x64xf32>
    %16 = arith.addf %13, %15 : vector<1x64xf32>
    %17 = math.rsqrt %16 : vector<1x64xf32>
    %18 = arith.mulf %14, %17 : vector<1x64xf32>
    %c0_13 = arith.constant 0 : index
    %c0_14 = arith.constant 0 : index
    %19 = vector.load %arg4[%c0_13, %c0_14] : memref<1x64xf32, #tpu.memory_space<vmem>>, vector<1x64xf32>
    %20 = arith.mulf %18, %19 : vector<1x64xf32>
    %c0_15 = arith.constant 0 : index
    %c0_16 = arith.constant 0 : index
    %21 = vector.load %arg5[%c0_15, %c0_16] : memref<1x64xf32, #tpu.memory_space<vmem>>, vector<1x64xf32>
    %22 = arith.addf %20, %21 : vector<1x64xf32>
    %23 = arith.negf %22 : vector<1x64xf32>
    %24 = math.exp %23 : vector<1x64xf32>
    %cst_17 = arith.constant 1.000000e+00 : f32
    %25 = vector.broadcast %cst_17 : f32 to vector<1x64xf32>
    %26 = arith.addf %25, %24 : vector<1x64xf32>
    %27 = arith.divf %25, %26 : vector<1x64xf32>
    %cst_18 = arith.constant 1.000000e+00 : f32
    %28 = vector.broadcast %cst_18 : f32 to vector<1x64xf32>
    %29 = arith.addf %28, %27 : vector<1x64xf32>
    %c0_19 = arith.constant 0 : index
    %c0_20 = arith.constant 0 : index
    %30 = vector.load %arg6[%c0_19, %c0_20] : memref<32x64xf32, #tpu.memory_space<vmem>>, vector<32x64xf32>
    %31 = vector.shape_cast %30 : vector<32x64xf32> to vector<1x32x64xf32>
    %32 = vector.shape_cast %29 : vector<1x64xf32> to vector<1x1x64xf32>
    %33 = vector.broadcast %32 : vector<1x1x64xf32> to vector<1x32x64xf32>
    %34 = arith.mulf %31, %33 : vector<1x32x64xf32>
    "tpu.trace_start"() <{level = 10 : i32, message = "boc,bcl->bol"}> : () -> ()
    %cst_21 = arith.constant dense<0.000000e+00> : vector<1x32x256xf32>
    %35 = tpu.matmul %34, %0, %cst_21 {dimension_numbers = #tpu.dot_dimension_numbers<[2], [1], [1], [2], [0, 0, 0, 1, 1, 2], [0], [0]>} : vector<1x32x64xf32>, vector<1x64x256xf32>, vector<1x32x256xf32> -> vector<1x32x256xf32>
    "tpu.trace_stop"() : () -> ()
    %c0_22 = arith.constant 0 : index
    %c0_23 = arith.constant 0 : index
    %36 = vector.load %arg7[%c0_22, %c0_23] : memref<1x32xf32, #tpu.memory_space<vmem>>, vector<1x32xf32>
    %37 = vector.shape_cast %3 : vector<1x64xf32> to vector<1x1x64xf32>
    %38 = vector.broadcast %37 : vector<1x1x64xf32> to vector<1x32x64xf32>
    %39 = arith.mulf %34, %38 : vector<1x32x64xf32>
    %cst_24 = arith.constant dense<0.000000e+00> : vector<1x32xf32>
    %40 = vector.multi_reduction <add>, %39, %cst_24 [2] : vector<1x32x64xf32> to vector<1x32xf32>
    %41 = arith.mulf %35, %35 : vector<1x32x256xf32>
    %cst_25 = arith.constant dense<0.000000e+00> : vector<1x32xf32>
    %42 = vector.multi_reduction <add>, %41, %cst_25 [2] : vector<1x32x256xf32> to vector<1x32xf32>
    %cst_26 = arith.constant 3.906250e-03 : f32
    %43 = vector.broadcast %cst_26 : f32 to vector<1x32xf32>
    %44 = arith.mulf %42, %43 : vector<1x32xf32>
    %45 = arith.addf %40, %36 : vector<1x32xf32>
    %cst_27 = arith.constant 2.000000e+00 : f32
    %46 = vector.broadcast %cst_27 : f32 to vector<1x32xf32>
    %47 = arith.mulf %46, %36 : vector<1x32xf32>
    %48 = arith.mulf %47, %40 : vector<1x32xf32>
    %49 = arith.addf %44, %48 : vector<1x32xf32>
    %50 = arith.mulf %36, %36 : vector<1x32xf32>
    %51 = arith.addf %49, %50 : vector<1x32xf32>
    %c0_28 = arith.constant 0 : index
    %c0_29 = arith.constant 0 : index
    %52 = vector.load %arg11[%c0_28, %c0_29] : memref<32x32xf32, #tpu.memory_space<vmem>>, vector<32x32xf32>
    %cst_30 = arith.constant dense<0.000000e+00> : vector<1x32xf32>
    %53 = tpu.matmul %45, %52, %cst_30 {dimension_numbers = #tpu.dot_dimension_numbers<[1], [0], [0], [1], [0, 0, 1, 1], [], []>} : vector<1x32xf32>, vector<32x32xf32>, vector<1x32xf32> -> vector<1x32xf32>
    %cst_31 = arith.constant dense<0.000000e+00> : vector<1x32xf32>
    %54 = tpu.matmul %51, %52, %cst_31 {dimension_numbers = #tpu.dot_dimension_numbers<[1], [0], [0], [1], [0, 0, 1, 1], [], []>} : vector<1x32xf32>, vector<32x32xf32>, vector<1x32xf32> -> vector<1x32xf32>
    %55 = arith.mulf %53, %53 : vector<1x32xf32>
    %56 = arith.subf %54, %55 : vector<1x32xf32>
    %c0_32 = arith.constant 0 : index
    %c0_33 = arith.constant 0 : index
    %57 = vector.load %arg8[%c0_32, %c0_33] : memref<1x32xf32, #tpu.memory_space<vmem>>, vector<1x32xf32>
    %cst_34 = arith.constant 9.99999974E-6 : f32
    %58 = vector.broadcast %cst_34 : f32 to vector<1x32xf32>
    %59 = arith.addf %56, %58 : vector<1x32xf32>
    %60 = math.rsqrt %59 : vector<1x32xf32>
    %61 = arith.mulf %57, %60 : vector<1x32xf32>
    %62 = arith.subf %36, %53 : vector<1x32xf32>
    %63 = arith.mulf %62, %61 : vector<1x32xf32>
    %c0_35 = arith.constant 0 : index
    %c0_36 = arith.constant 0 : index
    %64 = vector.load %arg9[%c0_35, %c0_36] : memref<1x32xf32, #tpu.memory_space<vmem>>, vector<1x32xf32>
    %65 = arith.addf %63, %64 : vector<1x32xf32>
    %66 = vector.shape_cast %61 : vector<1x32xf32> to vector<1x32x1xf32>
    %67 = vector.broadcast %66 : vector<1x32x1xf32> to vector<1x32x256xf32>
    %68 = arith.mulf %35, %67 : vector<1x32x256xf32>
    %69 = vector.shape_cast %65 : vector<1x32xf32> to vector<1x32x1xf32>
    %70 = vector.broadcast %69 : vector<1x32x1xf32> to vector<1x32x256xf32>
    %71 = arith.addf %68, %70 : vector<1x32x256xf32>
    %c0_37 = arith.constant 0 : index
    %c0_38 = arith.constant 0 : index
    %c0_39 = arith.constant 0 : index
    %72 = vector.load %arg12[%c0_37, %c0_38, %c0_39] : memref<1x32x256xf32, #tpu.memory_space<vmem>>, vector<1x32x256xf32>
    tpu.vector_store %arg12[%c0_37, %c0_38, %c0_39], %71 {strides = array<i32>} : memref<1x32x256xf32, #tpu.memory_space<vmem>>, vector<1x32x256xf32>,
    return
  }
  func.func @transform_0(%arg0: i32) -> (i32, i32, i32) {
    %c0_i32 = arith.constant 0 : i32
    %c0_i32_0 = arith.constant 0 : i32
    %c0_i32_1 = arith.constant 0 : i32
    return %arg0, %c0_i32, %c0_i32_0 : i32, i32, i32
  }
  func.func @transform_1(%arg0: i32) -> (i32, i32) {
    %c0_i32 = arith.constant 0 : i32
    %c0_i32_0 = arith.constant 0 : i32
    %c0_i32_1 = arith.constant 0 : i32
    return %c0_i32, %c0_i32_0 : i32, i32
  }
  func.func @transform_2(%arg0: i32) -> (i32, i32) {
    %c0_i32 = arith.constant 0 : i32
    %c0_i32_0 = arith.constant 0 : i32
    %c0_i32_1 = arith.constant 0 : i32
    return %c0_i32, %c0_i32_0 : i32, i32
  }
  func.func @transform_3(%arg0: i32) -> (i32, i32) {
    %c0_i32 = arith.constant 0 : i32
    %c0_i32_0 = arith.constant 0 : i32
    %c0_i32_1 = arith.constant 0 : i32
    return %c0_i32, %c0_i32_0 : i32, i32
  }
  func.func @transform_4(%arg0: i32) -> (i32, i32) {
    %c0_i32 = arith.constant 0 : i32
    %c0_i32_0 = arith.constant 0 : i32
    %c0_i32_1 = arith.constant 0 : i32
    return %c0_i32, %c0_i32_0 : i32, i32
  }
  func.func @transform_5(%arg0: i32) -> (i32, i32) {
    %c0_i32 = arith.constant 0 : i32
    %c0_i32_0 = arith.constant 0 : i32
    %c0_i32_1 = arith.constant 0 : i32
    return %c0_i32, %c0_i32_0 : i32, i32
  }
  func.func @transform_6(%arg0: i32) -> (i32, i32) {
    %c0_i32 = arith.constant 0 : i32
    %c0_i32_0 = arith.constant 0 : i32
    %c0_i32_1 = arith.constant 0 : i32
    return %c0_i32, %c0_i32_0 : i32, i32
  }
  func.func @transform_7(%arg0: i32) -> (i32, i32) {
    %c0_i32 = arith.constant 0 : i32
    %c0_i32_0 = arith.constant 0 : i32
    %c0_i32_1 = arith.constant 0 : i32
    return %c0_i32, %c0_i32_0 : i32, i32
  }
  func.func @transform_8(%arg0: i32) -> (i32, i32) {
    %c0_i32 = arith.constant 0 : i32
    %c0_i32_0 = arith.constant 0 : i32
    %c0_i32_1 = arith.constant 0 : i32
    return %c0_i32, %c0_i32_0 : i32, i32
  }
  func.func @transform_9(%arg0: i32) -> (i32, i32) {
    %c0_i32 = arith.constant 0 : i32
    %c0_i32_0 = arith.constant 0 : i32
    %c0_i32_1 = arith.constant 0 : i32
    return %c0_i32, %c0_i32_0 : i32, i32
  }
  func.func @transform_10(%arg0: i32) -> (i32, i32) {
    %c0_i32 = arith.constant 0 : i32
    %c0_i32_0 = arith.constant 0 : i32
    %c0_i32_1 = arith.constant 0 : i32
    return %c0_i32, %c0_i32_0 : i32, i32
  }
  func.func @transform_11(%arg0: i32) -> (i32, i32, i32) {
    %c0_i32 = arith.constant 0 : i32
    %c0_i32_0 = arith.constant 0 : i32
    %c0_i32_1 = arith.constant 0 : i32
    return %arg0, %c0_i32, %c0_i32_0 : i32, i32, i32
  }
}

</mosaic_0001>

<bundles_post_ra>
// kernel: feature_selection_module.1
= control target key start
LH: loop header
LB: loop body
LE: loop exit
PB: predicated region body
PF: predicated region fallthrough
CT: control target
= control target key end

     0   :  { %s2025_s17 = smov 0   ;;  %s2520_s0 = inlined_call_operand.vmem [shape: f32[2,64,256], index: 0, kind: input, shape index: {}]   ;;  %s2521_s1 = inlined_call_operand.vmem [shape: f32[64,64], index: 1, kind: input, shape index: {}]   ;;  %s2522_s2 = inlined_call_operand.vmem [shape: f32[1,64], index: 2, kind: input, shape index: {}]   ;;  %s2523_s3 = inlined_call_operand.vmem [shape: f32[1,64], index: 3, kind: input, shape index: {}]   ;;  %s2524_s4 = inlined_call_operand.vmem [shape: f32[1,64], index: 4, kind: input, shape index: {}]   ;;  %s2525_s5 = inlined_call_operand.vmem [shape: f32[32,64], index: 5, kind: input, shape index: {}]   ;;  %s2526_s6 = inlined_call_operand.vmem [shape: f32[1,32], index: 6, kind: input, shape index: {}]   ;;  %s2527_s7 = inlined_call_operand.vmem [shape: f32[1,32], index: 7, kind: input, shape index: {}]   ;;  %s2528_s8 = inlined_call_operand.vmem [shape: f32[1,32], index: 8, kind: input, shape index: {}]   ;;  %s2529_s9 = inlined_call_operand.vmem [shape: f32[64,64], index: 9, kind: input, shape index: {}]   ;;  %s2530_s10 = inlined_call_operand.vmem [shape: f32[32,32], index: 10, kind: input, shape index: {}]   ;;  %s2531_s11 = inlined_call_operand.vmem [shape: f32[2,32,256], index: 11, kind: output, shape index: {}]  }
   0x1 LB: > { %s1726_s18 = sadd.s32 4294967295, %s1958_s17   ;;  %p1730_p0 = scmp.ge.s32.totalorder %s1958_s17, 1  ;;  %s1958_s17 = sphi %s2025_s17, %s21_s17  }
   0x2   : > { %p337_p1 = scmp.lt.s32.totalorder %s1958_s17, 3 }
   0x4   : > { %p338_p2 = pnand %p1730_p0, %p337_p1 }
   0x5   : > { %p377_p3 = scmp.lt.s32.totalorder (!%p338_p2), %s1726_s18, 1  ;;  %v435_v32 = vld [vmem:[%s2521_s1] sm:$0xff] (!%p338_p2)  ;;  %v436_v33 = vld [vmem:[%s2521_s1 + $0x8] sm:$0xff] (!%p338_p2)  ;;  %v1960_v35 = vmov (!%p338_p2), 0.0|0.0   ;;  %v437_v36 = vld [vmem:[%s2521_s1 + $0x10] sm:$0xff] (!%p338_p2)  ;;  %vm1961_vm0 = vmmov (!%p338_p2), 0   ;;  %v452_v55 = vlaneseq (!%p338_p2) }
   0x6   : > { %341 = sbr.rel (%p338_p2) target bundleno = 1591 (0x637), region = 64  ;;  %v1866_v34 = vpack.c.bf16 (!%p338_p2), %v436_v33, %v435_v32  ;;  %1865 = vmatprep.subr.bf16.mxu0 (!%p338_p2), %v1960_v35  ;;  %1877 = vmatprep.subr.bf16.mxu1 (!%p338_p2), %v1960_v35  ;;  %v438_v37 = vld [vmem:[%s2521_s1 + $0x18] sm:$0xff] (!%p338_p2)  ;;  %v439_v39 = vld [vmem:[%s2521_s1 + $0x20] sm:$0xff] (!%p338_p2)  ;;  %v440_v40 = vld [vmem:[%s2521_s1 + $0x28] sm:$0xff] (!%p338_p2)  ;;  %v1962_v45 = vmov (!%p338_p2), 0.0   ;;  %vm463_vm1 = vcmask (!%p338_p2), 130112  }
   0x7   : > { %v1869_v38 = vpack.c.bf16 (!%p338_p2), %v438_v37, %v437_v36  ;;  %v1872_v41 = vpack.c.bf16 (!%p338_p2), %v440_v40, %v439_v39  ;;  %v441_v42 = vld [vmem:[%s2521_s1 + $0x30] sm:$0xff] (!%p338_p2)  ;;  %v442_v43 = vld [vmem:[%s2521_s1 + $0x38] sm:$0xff] (!%p338_p2)  ;;  %1802 = vmatprep.mubr.msk.f32.mxu0 (!%p338_p2), %vm1961_vm0, %v1962_v45  ;;  %1821 = vmatprep.mubr.msk.f32.mxu1 (!%p338_p2), %vm1961_vm0, %v1962_v45  ;;  %v580_v46 = vld [vmem:[%s2529_s9] sm:$0xff] (!%p338_p2)  ;;  %v453_v56 = vand.u32 (!%p338_p2), 127, %v452_v55  ;;  %v2167_v57 = vshrl.u32 (!%p338_p2), %v452_v55, 7 }
   0x8   : > { %1867 = vmatpush3.bf16.msra.mxu0 (!%p338_p2), %v1866_v34  ;;  %v1875_v44 = vpack.c.bf16 (!%p338_p2), %v442_v43, %v441_v42  ;;  %v581_v47 = vld [vmem:[%s2529_s9 + $0x8] sm:$0xff] (!%p338_p2)  ;;  %v582_v49 = vld [vmem:[%s2529_s9 + $0x10] sm:$0xff] (!%p338_p2)  ;;  %v583_v50 = vld [vmem:[%s2529_s9 + $0x18] sm:$0xff] (!%p338_p2)  ;;  %vm470_vm2 = vcmask (!%p338_p2), 195712   ;;  %vm477_vm3 = vcmask (!%p338_p2), 261312   ;;  %vm484_vm4 = vcmask (!%p338_p2), 326912  }
   0x9   : > { %1868 = vmatprep.subr.bf16.mxu0 (!%p338_p2), %v1960_v35  ;;  %v2143_v48 = vpack.c.bf16 (!%p338_p2), %v581_v47, %v580_v46  ;;  %v2152_v51 = vpack.c.bf16 (!%p338_p2), %v583_v50, %v582_v49  ;;  %v584_v52 = vld [vmem:[%s2529_s9 + $0x20] sm:$0xff] (!%p338_p2)  ;;  %v585_v53 = vld [vmem:[%s2529_s9 + $0x28] sm:$0xff] (!%p338_p2)  ;;  %v458_v58 = vadd.s32 (!%p338_p2), 4294967288, %v453_v56  ;;  %v465_v60 = vadd.s32 (!%p338_p2), 4294967280, %v453_v56 }
   0xa   : > { %v2162_v54 = vpack.c.bf16 (!%p338_p2), %v585_v53, %v584_v52  ;;  %v472_v61 = vadd.s32 (!%p338_p2), 4294967272, %v453_v56  ;;  %v2170_v63 = vsub.s32 (!%p338_p2), %v453_v56, %v2167_v57  ;;  %v493_v39 = vadd.s32 (!%p338_p2), 4294967248, %v453_v56 }
   0xb   : > { %1879 = vmatpush3.bf16.msra.mxu1 (!%p338_p2), %v2143_v48  ;;  %vm491_vm5 = vcmask (!%p338_p2), 392512   ;;  %vm498_vm6 = vcmask (!%p338_p2), 458112   ;;  %vm505_vm7 = vcmask (!%p338_p2), 523712   ;;  %vm507_vm8 = vcmask (!%p338_p2), 523264  }
   0xc   : > { %1870 = vmatpush3.bf16.msra.mxu0 (!%p338_p2), %v1869_v38  ;;  %1880 = vmatprep.subr.bf16.mxu1 (!%p338_p2), %v1960_v35  ;;  %vm1419_vm9 = vcmask (!%p338_p2), 261120  }
   0xd   : > { %s2533_s18 = smov (!%p377_p3, %s1726_s18), 1  ;;  %1871 = vmatprep.subr.bf16.mxu0 %v1960_v35 }
   0xe   : > { %s1747_s19 = sshll.u32 %s2533_s18, 7  ;;  %s1748_s13 = sshll.u32 %s2533_s18, 6 }
   0xf   : > { %s381_s22 = scalar_lea.vmem %s2520_s0, %s1747_s19  ;;  %1882 = vmatpush3.bf16.msra.mxu1 %v2152_v51  ;;  %s386_s16 = scalar_lea.vmem %s2531_s11, %s1748_s13 }
  0x10   : > { %v2039_v0 = vld [vmem:[%s381_s22] sm:$0xff]  ;;  %v2041_v1 = vld [vmem:[%s381_s22 + $0x8] sm:$0xff]  ;;  %v2043_v2 = vld [vmem:[%s381_s22 + $0x10] sm:$0xff]  ;;  %1873 = vmatpush3.bf16.msra.mxu0 %v1872_v41  ;;  %1883 = vmatprep.subr.bf16.mxu1 %v1960_v35 }
  0x11   : > { %v2045_v3 = vld [vmem:[%s381_s22 + $0x18] sm:$0xff]  ;;  %v403_v4 = vadd.f32 %v2041_v1, %v2039_v0  ;;  %v1903_v5 = vpack.c.bf16 %v2043_v2, %v2039_v0  ;;  %v2051_v6 = vld [vmem:[%s381_s22 + $0x20] sm:$0xff]  ;;  %v2053_v7 = vld [vmem:[%s381_s22 + $0x28] sm:$0xff]  ;;  %1874 = vmatprep.subr.bf16.mxu0 %v1960_v35 }
  0x12   : > { %v1901_v8 = vpack.c.bf16 %v2045_v3, %v2041_v1  ;;  %v2057_v9 = vld [vmem:[%s381_s22 + $0x30] sm:$0xff]  ;;  %v2059_v10 = vld [vmem:[%s381_s22 + $0x38] sm:$0xff]  ;;  %v409_v11 = vadd.f32 %v2053_v7, %v2051_v6  ;;  %v2063_v12 = vld [vmem:[%s381_s22 + $0x40] sm:$0xff]  ;;  %v406_v15 = vadd.f32 %v2045_v3, %v2043_v2 }
  0x13   : > { %404 = vadd.xlane.f32.xlu0 %v403_v4  ;;  %v1905_v13 = vpack.c.bf16 %v2059_v10, %v2053_v7  ;;  %v1907_v14 = vpack.c.bf16 %v2057_v9, %v2051_v6  ;;  %v2071_v16 = vld [vmem:[%s381_s22 + $0x48] sm:$0xff]  ;;  %v2073_v17 = vld [vmem:[%s381_s22 + $0x50] sm:$0xff]  ;;  %v2075_v18 = vld [vmem:[%s381_s22 + $0x58] sm:$0xff]  ;;  %v412_v19 = vadd.f32 %v2059_v10, %v2057_v9  ;;  %1885 = vmatpush3.bf16.msra.mxu1 %v2162_v54 }
  0x14   : > { %410 = vadd.xlane.f32.xlu1 %v409_v11  ;;  %v1909_v20 = vpack.c.bf16 %v2075_v18, %v2071_v16  ;;  %v1911_v21 = vpack.c.bf16 %v2073_v17, %v2063_v12  ;;  %v2083_v22 = vld [vmem:[%s381_s22 + $0x60] sm:$0xff]  ;;  %v2085_v23 = vld [vmem:[%s381_s22 + $0x70] sm:$0xff]  ;;  %v2087_v24 = vld [vmem:[%s381_s22 + $0x68] sm:$0xff]  ;;  %v415_v28 = vadd.f32 %v2071_v16, %v2063_v12  ;;  %v418_v29 = vadd.f32 %v2075_v18, %v2073_v17 }
  0x15   : > { %v2089_v25 = vld [vmem:[%s381_s22 + $0x78] sm:$0xff]  ;;  %v1915_v26 = vpack.c.bf16 %v2085_v23, %v2083_v22  ;;  %v421_v30 = vadd.f32 %v2087_v24, %v2083_v22  ;;  %1876 = vmatpush3.bf16.msra.mxu0 %v1875_v44  ;;  %1886 = vmatprep.subr.bf16.mxu1 %v1960_v35  ;;  %v2173_v11 = vsub.s32 %v458_v58, %v2167_v57  ;;  %v500_v44 = vadd.s32 4294967240, %v453_v56  ;;  %v741_v10 = vld [vmem:[%s2523_s3] sm:$0x1] }
  0x16   : > { %v1913_v27 = vpack.c.bf16 %v2089_v25, %v2087_v24  ;;  %v424_v31 = vadd.f32 %v2089_v25, %v2085_v23  ;;  %1889 = vmatprep.subr.bf16.mxu0 %v1960_v35  ;;  %v496_v58 = vsub.s32 %v493_v39, %v2167_v57  ;;  %v752_v24 = vld [vmem:[%s2525_s5] sm:$0xff]  ;;  %v753_v25 = vld [vmem:[%s2525_s5 + $0x8] sm:$0xff] }
  0x17   : > { %407 = vadd.xlane.f32.xlu0 %v406_v15  ;;  %v479_v15 = vadd.s32 4294967264, %v453_v56 }
  0x18   : > { %413 = vadd.xlane.f32.xlu1 %v412_v19  ;;  %v2176_v19 = vsub.s32 %v465_v60, %v2167_v57 }
  0x19   : > { %v482_v38 = vsub.s32 %v479_v15, %v2167_v57 }
  0x1b   : > { %416 = vadd.xlane.f32.xlu0 %v415_v28 }
  0x1c   : > { %419 = vadd.xlane.f32.xlu1 %v418_v29 }
  0x1f   : > { %422 = vadd.xlane.f32.xlu0 %v421_v30  ;;  %v2179_v30 = vsub.s32 %v472_v61, %v2167_v57  ;;  %v503_v61 = vsub.s32 %v500_v44, %v2167_v57 }
  0x20   : > { %425 = vadd.xlane.f32.xlu1 %v424_v31  ;;  %v486_v31 = vadd.s32 4294967256, %v453_v56 }
  0x22   : > { %v489_v43 = vsub.s32 %v486_v31, %v2167_v57 }
  0xa0   : > { %v405_v59 = vpop.xlane.xlu0 %404 }
  0xa1   : > { %v411_v62 = vpop.xlane.xlu1 %410  ;;  %v427_v4 = vmul.f32 0.00390625, %v405_v59 }
  0xa2   : > { %v429_v28 = vmul.f32 0.00390625, %v411_v62 }
  0xa3   : > { %v457_v36 = vrot.slane %v427_v4, %v2170_v63 }
  0xa4   : > { %v408_v29 = vpop.xlane.xlu0 %407  ;;  %v469_v40 = vrot.slane %v429_v28, %v2176_v19 }
  0xa5   : > { %v428_v32 = vmul.f32 0.00390625, %v408_v29  ;;  %v414_v33 = vpop.xlane.xlu1 %413 }
  0xa6   : > { %v430_v34 = vmul.f32 0.00390625, %v414_v33 }
  0xa7   : > { %v462_v37 = vrot.slane %v428_v32, %v2173_v11 }
  0xa8   : > { %v476_v41 = vrot.slane %v430_v34, %v2179_v30  ;;  %v417_v42 = vpop.xlane.xlu0 %416  ;;  %v586_v34 = vld [vmem:[%s2529_s9 + $0x30] sm:$0xff] }
  0xa9   : > { %v464_v46 = vsel %vm463_vm1, %v462_v37, %v457_v36  ;;  %v431_v47 = vmul.f32 0.00390625, %v417_v42  ;;  %v420_v49 = vpop.xlane.xlu1 %419 }
  0xaa   : > { %v471_v50 = vsel %vm470_vm2, %v469_v40, %v464_v46  ;;  %v432_v52 = vmul.f32 0.00390625, %v420_v49 }
  0xab   : > { %v478_v53 = vsel %vm477_vm3, %v476_v41, %v471_v50  ;;  %v483_v55 = vrot.slane %v431_v47, %v482_v38 }
  0xac   : > { %v490_v59 = vrot.slane %v432_v52, %v489_v43  ;;  %v423_v60 = vpop.xlane.xlu0 %422 }
  0xad   : > { %v485_v62 = vsel %vm484_vm4, %v483_v55, %v478_v53  ;;  %v433_v56 = vmul.f32 0.00390625, %v423_v60  ;;  %v426_v4 = vpop.xlane.xlu1 %425 }
  0xae   : > { %v434_v15 = vmul.f32 0.00390625, %v426_v4  ;;  %v492_v29 = vsel %vm491_vm5, %v490_v59, %v485_v62  ;;  %v2283_v59 = vld [vmem:[%s2526_s6] sm:$0x1]  ;;  %v1964_v62 = vmov 1966171168  }
  0xaf   : > { %v497_v28 = vrot.slane %v433_v56, %v496_v58  ;;  %v1085_v56 = vunpack.c.l.s4 %v1964_v62 }
  0xb0   : > { %v504_v31 = vrot.slane %v434_v15, %v503_v61  ;;  %v1963_v61 = vmov 0   ;;  %v2291_v15 = vsub.s32 1, %v2167_v57 }
  0xb1   : > { %v499_v32 = vsel %vm498_vm6, %v497_v28, %v492_v29  ;;  %1943 = vset.pattern.permute.xlu1 %v1963_v61  ;;  %1942 = vset.pattern.permute.xlu0 %v1963_v61  ;;  %v1086_v4 = vunpack.c.0.s8 %v1085_v56  ;;  %v2294_v28 = vsub.s32 2, %v2167_v57  ;;  %v2297_v29 = vsub.s32 3, %v2167_v57 }
  0xb2   : > { %v2192_v33 = vsel %vm505_vm7, %v504_v31, %v499_v32  ;;  %v2300_v31 = vsub.s32 4, %v2167_v57  ;;  %v2303_v32 = vsub.s32 5, %v2167_v57 }
  0xb3   : > { %1803 = vmatmul.mubr.msk.f32.vlgmr.msra.gmra.mrb[0].mxu0 %vm507_vm8, %v2192_v33 }
  0xb4   : > { %1891 = vmatpush3.bf16.msra.mxu0 %v2143_v48  ;;  %1840 = vmatprep.mubr.msk.f32.mxu0 %vm1961_vm0, %v1962_v45  ;;  %v587_v48 = vld [vmem:[%s2529_s9 + $0x38] sm:$0xff] }
  0xb5   : > { %1892 = vmatprep.subr.bf16.mxu0 %v1960_v35  ;;  %v1887_v36 = vpack.c.bf16 %v587_v48, %v586_v34  ;;  %v2309_v34 = vsub.s32 7, %v2167_v57  ;;  %v2312_v48 = vsub.s32 %v1086_v4, %v2167_v57 }
  0xb7   : > { %1888 = vmatpush3.bf16.msra.mxu1 %v1887_v36 }
  0xb8   : > { %1894 = vmatpush3.bf16.msra.mxu0 %v2152_v51  ;;  %1902 = vmatprep.subr.bf16.mxu1 %v1901_v8  ;;  %v443_v51 = vld [vmem:[%s2522_s2] sm:$0x1] }
  0xb9   : > { %1895 = vmatprep.subr.bf16.mxu0 %v1960_v35 }
  0xbc   : > { %1897 = vmatpush3.bf16.msra.mxu0 %v2162_v54 }
  0xbd   : > { %1898 = vmatprep.subr.bf16.mxu0 %v1960_v35 }
  0xc0   : > { %1900 = vmatpush3.bf16.msra.mxu0 %v1887_v36 }
  0xc1   : > { %1917 = vmatprep.subr.bf16.mxu0 %v1960_v35 }
 0x186   : > { %v576_v54 = vpop.f32.mrb[0].mxu0 }
 0x187   : > { %v577_v37 = vadd.f32 %v576_v54, %v443_v51  ;;  %v1804_v38 = vpop.f32.mrb[1].mxu0 }
 0x189   : > { %v661_v39 = vmul.f32 %v577_v37, %v577_v37  ;;  %1822 = vmatmul.mubr.msk.f32.vlgmr.msra.gmra.mrb[0].mxu1 %vm507_vm8, %v577_v37 }
 0x18a   : > { %1904 = vmatpush1.bf16.msra.mxu1 %v1903_v5  ;;  %840 = vmatprep.mubr.f32.mxu1 %v1962_v45 }
 0x18b   : > { %1841 = vmatmul.mubr.msk.f32.vlgmr.msra.gmra.mrb[2].mxu0 %vm507_vm8, %v661_v39  ;;  %1906 = vmatprep.subr.bf16.mxu1 %v1905_v13  ;;  %v743_v13 = vld [vmem:[%s2524_s4] sm:$0x1] }
 0x18c   : > { %1851 = vmatprep.mubr.msk.f32.mxu0 %vm1961_vm0, %v1962_v45 }
 0x18e   : > { %1908 = vmatpush1.bf16.msra.mxu1 %v1907_v14 }
 0x18f   : > { %1910 = vmatprep.subr.bf16.mxu1 %v1909_v20 }
 0x192   : > { %1912 = vmatpush1.bf16.msra.mxu1 %v1911_v21  ;;  %v2250_v21 = vsub.s32 0, %v2167_v57 }
 0x193   : > { %1914 = vmatprep.subr.bf16.mxu1 %v1913_v27  ;;  %v754_v27 = vld [vmem:[%s2525_s5 + $0x10] sm:$0xff] }
 0x194   : > { %v2287_v60 = vrot.slane %v2283_v59, %v2250_v21 }
 0x196   : > { %1916 = vmatpush1.bf16.msra.mxu1 %v1915_v26  ;;  %v755_v26 = vld [vmem:[%s2525_s5 + $0x18] sm:$0xff] }
 0x25c   : > { %v657_v0 = vpop.f32.mrb[0].mxu1 }
 0x25d   : > { %v735_v1 = vmul.f32 %v657_v0, %v657_v0  ;;  %v1823_v2 = vpop.f32.mrb[1].mxu1  ;;  %v737_v8 = vsub.f32 %v577_v37, %v657_v0 }
 0x25e   : > { %v731_v3 = vpop.f32.mrb[2].mxu0 }
 0x25f   : > { %v736_v5 = vsub.f32 %v731_v3, %v735_v1  ;;  %v1842_v6 = vpop.f32.mrb[3].mxu0 }
 0x261   : > { %v738_v7 = vadd.f32 1e-05, %v736_v5 }
 0x263   : > { %1944 = vrsqrt.f32 %v738_v7 }
 0x26d   : > { %v1945_v9 = vpop.eup %1944 }
 0x26e   : > { %v740_v12 = vmul.f32 %v1945_v9, %v737_v8 }
 0x270   : > { %v742_v14 = vmul.f32 %v741_v10, %v740_v12 }
 0x272   : > { %v744_v16 = vadd.f32 %v743_v13, %v742_v14 }
 0x274   : > { %v1738_v17 = vmul.f32 -1.442695, %v744_v16 }
 0x276   : > { %1946 = vpow2.f32 %v1738_v17 }
 0x280   : > { %v1947_v18 = vpop.eup %1946 }
 0x281   : > { %v748_v20 = vadd.f32 1.0, %v1947_v18 }
 0x283   : > { %1948 = vrcp.f32 %v748_v20 }
 0x28d   : > { %v1949_v22 = vpop.eup %1948 }
 0x28e   : > { %v751_v23 = vadd.f32 1.0, %v1949_v22 }
 0x290   : > { %v759_v40 = vrot.slane %v751_v23, %v2250_v21 }
 0x292   : > { %v760_v41 = vmul.f32 %v759_v40, %v752_v24  ;;  %v761_v42 = vmul.f32 %v759_v40, %v753_v25  ;;  %v763_v43 = vmul.f32 %v759_v40, %v755_v26  ;;  %v762_v44 = vmul.f32 %v759_v40, %v754_v27 }
 0x294   : > { %1739 = vmatmul.mubr.msk.f32.vlgmr.msra.gmra.mrb[2].mxu1 %vm507_vm8, %v760_v41  ;;  %v880_v46 = vmul.f32 %v761_v42, %v2192_v33  ;;  %v879_v47 = vmul.f32 %v760_v41, %v2192_v33  ;;  %v882_v52 = vmul.f32 %v763_v43, %v2192_v33  ;;  %v881_v53 = vmul.f32 %v762_v44, %v2192_v33 }
 0x295   : > { %846 = vmatprep.mubr.f32.mxu1 %v1962_v45  ;;  %v2306_v33 = vsub.s32 6, %v2167_v57 }
 0x296   : > { %v886_v49 = vsel %vm507_vm8, %v880_v46, 0.0  ;;  %v883_v50 = vsel %vm507_vm8, %v879_v47, 0.0  ;;  %v892_v55 = vsel %vm507_vm8, %v882_v52, 0.0  ;;  %v889_v58 = vsel %vm507_vm8, %v881_v53, 0.0 }
 0x297   : > { %887 = vadd.xlane.f32.xlu1 %v886_v49  ;;  %884 = vadd.xlane.f32.xlu0 %v883_v50 }
 0x298   : > { %1740 = vmatmul.mubr.msk.f32.gmra.mrb[4].mxu1 %vm507_vm8, %v761_v42 }
 0x299   : > { %852 = vmatprep.mubr.f32.mxu1 %v1962_v45 }
 0x29b   : > { %893 = vadd.xlane.f32.xlu1 %v892_v55  ;;  %890 = vadd.xlane.f32.xlu0 %v889_v58 }
 0x29c   : > { %1741 = vmatmul.mubr.msk.f32.gmra.mrb[6].mxu1 %vm507_vm8, %v762_v44 }
 0x29d   : > { %858 = vmatprep.mubr.f32.mxu1 %v1962_v45 }
 0x2a0   : > { %1742 = vmatmul.mubr.msk.f32.gmra.mrb[8].mxu1 %vm507_vm8, %v763_v43 }
 0x2ac   : > { %925 = vbcast.lane.b32.xlu1 %v2287_v60, 256 }
 0x324   : > { %v2314_v36 = vpop.xlane.xlu1 %887  ;;  %v2316_v51 = vpop.xlane.xlu0 %884 }
 0x325   : > { %v987_v54 = vrot.slane %v2314_v36, %v2250_v21  ;;  %v991_v37 = vrot.slane %v2314_v36, %v2291_v15  ;;  %v995_v38 = vrot.slane %v2314_v36, %v2294_v28  ;;  %v999_v39 = vrot.slane %v2314_v36, %v2297_v29 }
 0x326   : > { %v1003_v57 = vrot.slane %v2314_v36, %v2300_v31  ;;  %v1007_v0 = vrot.slane %v2314_v36, %v2303_v32  ;;  %v1011_v1 = vrot.slane %v2314_v36, %v2306_v33  ;;  %v1015_v2 = vrot.slane %v2314_v36, %v2309_v34 }
 0x327   : > { %v1129_v3 = vcombine.low %v987_v54, %v991_v37  ;;  %v1130_v5 = vcombine.low %v995_v38, %v999_v39  ;;  %v955_v6 = vrot.slane %v2316_v51, %v2250_v21  ;;  %v959_v7 = vrot.slane %v2316_v51, %v2291_v15 }
 0x328   : > { %v1131_v8 = vcombine.low %v1003_v57, %v1007_v0  ;;  %v1132_v9 = vcombine.low %v1011_v1, %v1015_v2  ;;  %v963_v10 = vrot.slane %v2316_v51, %v2294_v28  ;;  %v967_v12 = vrot.slane %v2316_v51, %v2297_v29  ;;  %v2342_v13 = vpop.xlane.xlu0 %890  ;;  %v2368_v58 = vpop.xlane.xlu1 %893 }
 0x329   : > { %v1139_v14 = vrot.slane %v1129_v3, %v2312_v48  ;;  %v1146_v16 = vrot.slane %v1130_v5, %v2312_v48  ;;  %v971_v17 = vrot.slane %v2316_v51, %v2300_v31  ;;  %v975_v18 = vrot.slane %v2316_v51, %v2303_v32 }
 0x32a   : > { %v1153_v20 = vrot.slane %v1131_v8, %v2312_v48  ;;  %v1160_v22 = vrot.slane %v1132_v9, %v2312_v48  ;;  %v979_v23 = vrot.slane %v2316_v51, %v2306_v33  ;;  %v983_v24 = vrot.slane %v2316_v51, %v2309_v34 }
 0x32b   : > { %v1161_v25 = vcombine.low %v1139_v14, %v1146_v16  ;;  %v1080_v26 = vcombine.low %v955_v6, %v959_v7  ;;  %v1081_v27 = vcombine.low %v963_v10, %v967_v12  ;;  %v1082_v40 = vcombine.low %v971_v17, %v975_v18 }
 0x32c   : > { %v1162_v41 = vcombine.low %v1153_v20, %v1160_v22  ;;  %v1083_v42 = vcombine.low %v979_v23, %v983_v24  ;;  %v1019_v43 = vrot.slane %v2342_v13, %v2250_v21  ;;  %v1023_v49 = vrot.slane %v2342_v13, %v2291_v15 }
 0x32d   : > { %v1169_v44 = vrot.slane %v1161_v25, %v2312_v48  ;;  %v1090_v46 = vrot.slane %v1080_v26, %v2312_v48  ;;  %v1097_v47 = vrot.slane %v1081_v27, %v2312_v48  ;;  %v1104_v52 = vrot.slane %v1082_v40, %v2312_v48 }
 0x32e   : > { %v1176_v50 = vrot.slane %v1162_v41, %v2312_v48  ;;  %v1111_v53 = vrot.slane %v1083_v42, %v2312_v48  ;;  %v1027_v55 = vrot.slane %v2342_v13, %v2294_v28  ;;  %v1031_v62 = vrot.slane %v2342_v13, %v2297_v29 }
 0x32f   : > { %v1112_v61 = vcombine.low %v1090_v46, %v1097_v47  ;;  %v1035_v56 = vrot.slane %v2342_v13, %v2300_v31  ;;  %v1039_v4 = vrot.slane %v2342_v13, %v2303_v32  ;;  %v1043_v38 = vrot.slane %v2342_v13, %v2306_v33 }
 0x330   : > { %v1177_v54 = vcombine.low %v1169_v44, %v1176_v50  ;;  %v1113_v37 = vcombine.low %v1104_v52, %v1111_v53  ;;  %v1047_v39 = vrot.slane %v2342_v13, %v2309_v34  ;;  %v1178_v0 = vcombine.low %v1019_v43, %v1023_v49 }
 0x331   : > { %v1120_v57 = vrot.slane %v1112_v61, %v2312_v48  ;;  %v1179_v1 = vcombine.low %v1027_v55, %v1031_v62  ;;  %v1180_v2 = vcombine.low %v1035_v56, %v1039_v4  ;;  %v1051_v6 = vrot.slane %v2368_v58, %v2250_v21 }
 0x332   : > { %1280 = vperm.xlu1 %1943, %v1177_v54   ;;  %v1127_v3 = vrot.slane %v1113_v37, %v2312_v48  ;;  %v1181_v5 = vcombine.low %v1043_v38, %v1047_v39  ;;  %v1055_v7 = vrot.slane %v2368_v58, %v2291_v15  ;;  %v1188_v8 = vrot.slane %v1178_v0, %v2312_v48 }
 0x333   : > { %v1195_v9 = vrot.slane %v1179_v1, %v2312_v48  ;;  %v1202_v10 = vrot.slane %v1180_v2, %v2312_v48  ;;  %v1059_v12 = vrot.slane %v2368_v58, %v2294_v28  ;;  %v1063_v17 = vrot.slane %v2368_v58, %v2297_v29 }
 0x334   : > { %v1128_v14 = vcombine.low %v1120_v57, %v1127_v3  ;;  %v1209_v16 = vrot.slane %v1181_v5, %v2312_v48  ;;  %v1067_v18 = vrot.slane %v2368_v58, %v2300_v31  ;;  %v1071_v15 = vrot.slane %v2368_v58, %v2303_v32 }
 0x335   : > { %v1210_v20 = vcombine.low %v1188_v8, %v1195_v9  ;;  %v1075_v22 = vrot.slane %v2368_v58, %v2306_v33  ;;  %v1079_v23 = vrot.slane %v2368_v58, %v2309_v34  ;;  %v1227_v24 = vcombine.low %v1051_v6, %v1055_v7  ;;  %v926_v8 = vpop.permute.xlu1 %925 }
 0x336   : > { %1277 = vperm.xlu0 %1942, %v1128_v14   ;;  %v1211_v28 = vcombine.low %v1202_v10, %v1209_v16  ;;  %v1228_v25 = vcombine.low %v1059_v12, %v1063_v17  ;;  %v1229_v29 = vcombine.low %v1067_v18, %v1071_v15  ;;  %v1351_v33 = vmul.f32 %v2283_v59, %v2283_v59 }
 0x337   : > { %v1218_v26 = vrot.slane %v1210_v20, %v2312_v48  ;;  %v1230_v27 = vcombine.low %v1075_v22, %v1079_v23  ;;  %v1237_v40 = vrot.slane %v1227_v24, %v2312_v48  ;;  %v947_v24 = vmul.f32 2.0, %v2283_v59 }
 0x338   : > { %v1225_v31 = vrot.slane %v1211_v28, %v2312_v48  ;;  %v1244_v32 = vrot.slane %v1228_v25, %v2312_v48  ;;  %v1251_v41 = vrot.slane %v1229_v29, %v2312_v48  ;;  %v1356_v47 = vrot.slane %v1351_v33, %v2250_v21 }
 0x339   : > { %v1258_v34 = vrot.slane %v1230_v27, %v2312_v48 }
 0x33a   : > { %v1226_v42 = vcombine.low %v1218_v26, %v1225_v31  ;;  %v1259_v43 = vcombine.low %v1237_v40, %v1244_v32  ;;  %929 = vbcast.lane.b32.xlu0 %v2287_v60, 264  ;;  %v943_v40 = vadd.f32 %v926_v8, %v2316_v51  ;;  %v1383_v51 = vld [vmem:[%s2530_s10 + $0x18] sm:$0xff] }
 0x33b   : > { %v1260_v44 = vcombine.low %v1251_v41, %v1258_v34  ;;  %v1380_v34 = vld [vmem:[%s2530_s10] sm:$0xff] }
 0x33c   : > { %1283 = vperm.xlu1 %1943, %v1226_v42   ;;  %v1267_v46 = vrot.slane %v1259_v43, %v2312_v48  ;;  %v1381_v42 = vld [vmem:[%s2530_s10 + $0x8] sm:$0xff] }
 0x33d   : > { %v1274_v49 = vrot.slane %v1260_v44, %v2312_v48  ;;  %v1918_v43 = vpack.c.bf16 %v1381_v42, %v1380_v34 }
 0x33e   : > { %1362 = vbcast.lane.b32.xlu0 %v1356_v47, 264 }
 0x33f   : > { %v1275_v50 = vcombine.low %v1267_v46, %v1274_v49  ;;  %1919 = vmatpush3.bf16.msra.mxu0 %v1918_v43 }
 0x340   : > { %1920 = vmatprep.subr.bf16.mxu0 %v1960_v35 }
 0x341   : > { %1286 = vperm.xlu1 %1943, %v1275_v50  }
 0x345   : > { %933 = vbcast.lane.b32.xlu1 %v2287_v60, 272 }
 0x349   : > { %937 = vbcast.lane.b32.xlu1 %v2287_v60, 280 }
 0x34d   : > { %1358 = vbcast.lane.b32.xlu1 %v1356_v47, 256 }
 0x367   : > { %v2416_v52 = vpop.f32.mrb[2].mxu1 }
 0x368   : > { %v895_v53 = vmul.f32 %v2416_v52, %v2416_v52  ;;  %v2420_v55 = vpop.f32.mrb[3].mxu1 }
 0x369   : > { %v896_v61 = vmul.f32 %v2420_v55, %v2420_v55 }
 0x36b   : > { %v2424_v62 = vpop.f32.mrb[4].mxu1  ;;  %v903_v56 = vadd.f32 %v896_v61, %v895_v53 }
 0x36c   : > { %v897_v4 = vmul.f32 %v2424_v62, %v2424_v62  ;;  %v2428_v54 = vpop.f32.mrb[5].mxu1 }
 0x36d   : > { %v898_v60 = vmul.f32 %v2428_v54, %v2428_v54 }
 0x36f   : > { %v2432_v37 = vpop.f32.mrb[6].mxu1  ;;  %v906_v38 = vadd.f32 %v898_v60, %v897_v4 }
 0x370   : > { %v899_v39 = vmul.f32 %v2432_v37, %v2432_v37  ;;  %v2436_v57 = vpop.f32.mrb[7].mxu1 }
 0x371   : > { %904 = vadd.xlane.f32.xlu1 %v903_v56  ;;  %v900_v0 = vmul.f32 %v2436_v57, %v2436_v57  ;;  %907 = vadd.xlane.f32.xlu0 %v906_v38 }
 0x373   : > { %v2440_v1 = vpop.f32.mrb[8].mxu1  ;;  %v909_v2 = vadd.f32 %v900_v0, %v899_v39 }
 0x374   : > { %v901_v3 = vmul.f32 %v2440_v1, %v2440_v1  ;;  %v2444_v5 = vpop.f32.mrb[9].mxu1 }
 0x375   : > { %v902_v6 = vmul.f32 %v2444_v5, %v2444_v5  ;;  %910 = vadd.xlane.f32.xlu1 %v909_v2 }
 0x377   : > { %v912_v7 = vadd.f32 %v902_v6, %v901_v3 }
 0x379   : > { %913 = vadd.xlane.f32.xlu1 %v912_v7 }
 0x3b1   : > { %v1281_v9 = vpop.permute.xlu1 %1280 }
 0x3b2   : > { %v1295_v14 = vrot.slane %v1281_v9, %v2173_v11 }
 0x3b5   : > { %v1278_v10 = vpop.permute.xlu0 %1277 }
 0x3b6   : > { %v1291_v16 = vrot.slane %v1278_v10, %v2170_v63 }
 0x3b8   : > { %v1296_v20 = vsel %vm463_vm1, %v1295_v14, %v1291_v16 }
 0x3b9   : > { %v930_v31 = vpop.permute.xlu0 %929 }
 0x3ba   : > { %v944_v32 = vadd.f32 %v930_v31, %v2314_v36  ;;  %v1382_v36 = vld [vmem:[%s2530_s10 + $0x10] sm:$0xff] }
 0x3bb   : > { %v1284_v12 = vpop.permute.xlu1 %1283 }
 0x3bc   : > { %v1300_v17 = vrot.slane %v1284_v12, %v2176_v19 }
 0x3bd   : > { %v1363_v46 = vpop.permute.xlu0 %1362 }
 0x3be   : > { %v1301_v22 = vsel %vm470_vm2, %v1300_v17, %v1296_v20 }
 0x3c0   : > { %v1287_v18 = vpop.permute.xlu1 %1286 }
 0x3c1   : > { %v1305_v15 = vrot.slane %v1287_v18, %v2179_v30 }
 0x3c3   : > { %v1306_v23 = vsel %vm477_vm3, %v1305_v15, %v1301_v22 }
 0x3c4   : > { %v1313_v28 = vrot.slane %v1306_v23, %v2312_v48  ;;  %v934_v27 = vpop.permute.xlu1 %933 }
 0x3c6   : > { %v1320_v25 = vrot.slane %v1313_v28, %v2312_v48  ;;  %v945_v48 = vadd.f32 %v934_v27, %v2342_v13  ;;  %v1921_v13 = vpack.c.bf16 %v1383_v51, %v1382_v36 }
 0x3c8   : > { %v1322_v26 = vmul.f32 %v1320_v25, %v947_v24  ;;  %v938_v33 = vpop.permute.xlu1 %937  ;;  %1922 = vmatpush3.bf16.msra.mxu0 %v1921_v13 }
 0x3c9   : > { %v946_v41 = vadd.f32 %v938_v33, %v2368_v58  ;;  %1923 = vmatprep.subr.bf16.mxu0 %v1960_v35 }
 0x3ca   : > { %v1327_v29 = vrot.slane %v1322_v26, %v2250_v21 }
 0x3cc   : > { %1333 = vbcast.lane.b32.xlu0 %v1327_v29, 264  ;;  %1329 = vbcast.lane.b32.xlu1 %v1327_v29, 256  ;;  %v1359_v58 = vpop.permute.xlu1 %1358 }
 0x3d0   : > { %1341 = vbcast.lane.b32.xlu0 %v1327_v29, 280  ;;  %1337 = vbcast.lane.b32.xlu1 %v1327_v29, 272 }
 0x3d4   : > { %1370 = vbcast.lane.b32.xlu0 %v1356_v47, 280  ;;  %1366 = vbcast.lane.b32.xlu1 %v1356_v47, 272 }
 0x3d8   : > { %1392 = vperm.xlu0 %1942, %v944_v32   ;;  %1389 = vperm.xlu1 %1943, %v943_v40  }
 0x3dc   : > { %1398 = vperm.xlu0 %1942, %v946_v41   ;;  %1395 = vperm.xlu1 %1943, %v945_v48  }
 0x3fe   : > { %v905_v44 = vpop.xlane.xlu1 %904  ;;  %v908_v49 = vpop.xlane.xlu0 %907 }
 0x3ff   : > { %v915_v53 = vmul.f32 0.00390625, %v905_v44  ;;  %v916_v61 = vmul.f32 0.00390625, %v908_v49 }
 0x402   : > { %v911_v47 = vpop.xlane.xlu1 %910 }
 0x403   : > { %v917_v6 = vmul.f32 0.00390625, %v911_v47 }
 0x406   : > { %v914_v50 = vpop.xlane.xlu1 %913 }
 0x407   : > { %v918_v7 = vmul.f32 0.00390625, %v914_v50  ;;  %v1607_v50 = vld [vmem:[%s2528_s8] sm:$0x1] }
 0x43e   : > { %v1334_v56 = vpop.permute.xlu0 %1333  ;;  %v1330_v4 = vpop.permute.xlu1 %1329 }
 0x43f   : > { %v1348_v60 = vadd.f32 %v1334_v56, %v916_v61  ;;  %v1347_v38 = vadd.f32 %v1330_v4, %v915_v53 }
 0x441   : > { %v1377_v39 = vadd.f32 %v1363_v46, %v1348_v60  ;;  %v1376_v0 = vadd.f32 %v1359_v58, %v1347_v38 }
 0x442   : > { %v1342_v2 = vpop.permute.xlu0 %1341  ;;  %v1338_v3 = vpop.permute.xlu1 %1337 }
 0x443   : > { %1500 = vperm.xlu0 %1942, %v1377_v39   ;;  %1497 = vperm.xlu1 %1943, %v1376_v0   ;;  %v1350_v8 = vadd.f32 %v1342_v2, %v918_v7  ;;  %v1349_v9 = vadd.f32 %v1338_v3, %v917_v6 }
 0x446   : > { %v1371_v10 = vpop.permute.xlu0 %1370  ;;  %v1367_v12 = vpop.permute.xlu1 %1366 }
 0x447   : > { %v1379_v14 = vadd.f32 %v1371_v10, %v1350_v8  ;;  %v1378_v16 = vadd.f32 %v1367_v12, %v1349_v9 }
 0x449   : > { %1506 = vperm.xlu0 %1942, %v1379_v14   ;;  %1503 = vperm.xlu1 %1943, %v1378_v16  }
 0x457   : > { %v1393_v17 = vpop.permute.xlu0 %1392  ;;  %v1390_v18 = vpop.permute.xlu1 %1389 }
 0x458   : > { %v1407_v20 = vrot.slane %v1393_v17, %v2173_v11  ;;  %v1403_v15 = vrot.slane %v1390_v18, %v2170_v63 }
 0x45a   : > { %v1408_v25 = vsel %vm463_vm1, %v1407_v20, %v1403_v15 }
 0x45b   : > { %v1399_v22 = vpop.permute.xlu0 %1398  ;;  %v1396_v23 = vpop.permute.xlu1 %1395 }
 0x45c   : > { %v1417_v28 = vrot.slane %v1399_v22, %v2179_v30  ;;  %v1412_v24 = vrot.slane %v1396_v23, %v2176_v19 }
 0x45e   : > { %v1413_v26 = vsel %vm470_vm2, %v1412_v24, %v1408_v25 }
 0x45f   : > { %v1418_v29 = vsel %vm477_vm3, %v1417_v28, %v1413_v26 }
 0x460   : > { %1852 = vmatmul.mubr.msk.f32.vlgmr.msra.gmra.mrb[4].mxu0 %vm1419_vm9, %v1418_v29 }
 0x461   : > { %1925 = vmatpush3.bf16.msra.mxu0 %v1918_v43  ;;  %1862 = vmatprep.mubr.msk.f32.mxu0 %vm1961_vm0, %v1962_v45 }
 0x462   : > { %1926 = vmatprep.subr.bf16.mxu0 %v1960_v35 }
 0x465   : > { %1928 = vmatpush3.bf16.msra.mxu0 %v1921_v13 }
 0x4c2   : > { %v1501_v27 = vpop.permute.xlu0 %1500  ;;  %v1498_v31 = vpop.permute.xlu1 %1497 }
 0x4c3   : > { %v1515_v40 = vrot.slane %v1501_v27, %v2173_v11  ;;  %v1511_v32 = vrot.slane %v1498_v31, %v2170_v63 }
 0x4c5   : > { %v1516_v42 = vsel %vm463_vm1, %v1515_v40, %v1511_v32 }
 0x4c8   : > { %v1507_v33 = vpop.permute.xlu0 %1506  ;;  %v1504_v48 = vpop.permute.xlu1 %1503 }
 0x4c9   : > { %v1525_v41 = vrot.slane %v1507_v33, %v2179_v30  ;;  %v1520_v34 = vrot.slane %v1504_v48, %v2176_v19  ;;  %v1601_v19 = vld [vmem:[%s2527_s7] sm:$0x1] }
 0x4cb   : > { %v1521_v43 = vsel %vm470_vm2, %v1520_v34, %v1516_v42 }
 0x4cc   : > { %v1526_v45 = vsel %vm477_vm3, %v1525_v41, %v1521_v43 }
 0x4cd   : > { %1863 = vmatmul.mubr.msk.f32.vlgmr.msra.gmra.mrb[6].mxu0 %vm1419_vm9, %v1526_v45 }
 0x533   : > { %v1488_v35 = vpop.f32.mrb[4].mxu0 }
 0x534   : > { %v1853_v36 = vpop.f32.mrb[5].mxu0  ;;  %v1599_v51 = vmul.f32 %v1488_v35, %v1488_v35  ;;  %v1605_v44 = vsub.f32 %v2283_v59, %v1488_v35 }
 0x5a0   : > { %v1595_v11 = vpop.f32.mrb[6].mxu0 }
 0x5a1   : > { %v1600_v13 = vsub.f32 %v1595_v11, %v1599_v51  ;;  %v1864_v63 = vpop.f32.mrb[7].mxu0 }
 0x5a3   : > { %v1602_v58 = vadd.f32 1e-05, %v1600_v13 }
 0x5a5   : > { %1950 = vrsqrt.f32 %v1602_v58 }
 0x5af   : > { %v1951_v30 = vpop.eup %1950 }
 0x5b0   : > { %v1604_v46 = vmul.f32 %v1951_v30, %v1601_v19 }
 0x5b2   : > { %v1612_v47 = vrot.slane %v1604_v46, %v2250_v21  ;;  %v1606_v49 = vmul.f32 %v1605_v44, %v1604_v46 }
 0x5b4   : > { %1618 = vbcast.lane.b32.xlu0 %v1612_v47, 264  ;;  %1614 = vbcast.lane.b32.xlu1 %v1612_v47, 256  ;;  %v1608_v53 = vadd.f32 %v1607_v50, %v1606_v49 }
 0x5b6   : > { %v1639_v61 = vrot.slane %v1608_v53, %v2250_v21 }
 0x5b8   : > { %1626 = vbcast.lane.b32.xlu0 %v1612_v47, 280  ;;  %1622 = vbcast.lane.b32.xlu1 %v1612_v47, 272 }
 0x5bc   : > { %1645 = vbcast.lane.b32.xlu0 %v1639_v61, 264  ;;  %1641 = vbcast.lane.b32.xlu1 %v1639_v61, 256 }
 0x5c0   : > { %1653 = vbcast.lane.b32.xlu0 %v1639_v61, 280  ;;  %1649 = vbcast.lane.b32.xlu1 %v1639_v61, 272 }
 0x626   : > { %v1619_v59 = vpop.permute.xlu0 %1618  ;;  %v1615_v56 = vpop.permute.xlu1 %1614 }
 0x627   : > { %v1630_v38 = vmul.f32 %v1619_v59, %v2424_v62  ;;  %v1631_v39 = vmul.f32 %v1619_v59, %v2428_v54  ;;  %v1628_v0 = vmul.f32 %v1615_v56, %v2416_v52  ;;  %v1629_v2 = vmul.f32 %v1615_v56, %v2420_v55 }
 0x62a   : > { %v1627_v4 = vpop.permute.xlu0 %1626  ;;  %v1623_v60 = vpop.permute.xlu1 %1622 }
 0x62b   : > { %v1634_v10 = vmul.f32 %v1627_v4, %v2440_v1  ;;  %v1635_v62 = vmul.f32 %v1627_v4, %v2444_v5  ;;  %v1632_v54 = vmul.f32 %v1623_v60, %v2432_v37  ;;  %v1633_v52 = vmul.f32 %v1623_v60, %v2436_v57 }
 0x62e   : > { %v1646_v21 = vpop.permute.xlu0 %1645  ;;  %v1642_v3 = vpop.permute.xlu1 %1641 }
 0x62f   : > { %v1657_v6 = vadd.f32 %v1646_v21, %v1630_v38  ;;  %v1658_v7 = vadd.f32 %v1646_v21, %v1631_v39  ;;  %v1655_v8 = vadd.f32 %v1642_v3, %v1628_v0  ;;  %v1656_v9 = vadd.f32 %v1642_v3, %v1629_v2 }
 0x631   : > { %1665 = vst [vmem:[%s386_s16 + $0x10] sm:$0xff] %v1657_v6  ;;  %1666 = vst [vmem:[%s386_s16 + $0x18] sm:$0xff] %v1658_v7 }
 0x632   : > { %1663 = vst [vmem:[%s386_s16] sm:$0xff] %v1655_v8  ;;  %1664 = vst [vmem:[%s386_s16 + $0x8] sm:$0xff] %v1656_v9  ;;  %v1654_v55 = vpop.permute.xlu0 %1653  ;;  %v1650_v12 = vpop.permute.xlu1 %1649 }
 0x633   : > { %v1661_v14 = vadd.f32 %v1654_v55, %v1634_v10  ;;  %v1662_v16 = vadd.f32 %v1654_v55, %v1635_v62  ;;  %v1659_v17 = vadd.f32 %v1650_v12, %v1632_v54  ;;  %v1660_v18 = vadd.f32 %v1650_v12, %v1633_v52 }
 0x635   : > { %1669 = vst [vmem:[%s386_s16 + $0x30] sm:$0xff] %v1661_v14  ;;  %1670 = vst [vmem:[%s386_s16 + $0x38] sm:$0xff] %v1662_v16 }
 0x636   : > { %1667 = vst [vmem:[%s386_s16 + $0x20] sm:$0xff] %v1659_v17  ;;  %1668 = vst [vmem:[%s386_s16 + $0x28] sm:$0xff] %v1660_v18 }
 0x637 PF: > { %s21_s17 = sadd.s32 1, %s1958_s17  }
 0x638   : > { %p18_p4 = scmp.ge.s32.totalorder %s21_s17, 4  }
 0x63a   :  { %20 = sbr.rel (!%p18_p4) target bundleno = 1 (0x1), region = 94 }

</bundles_post_ra>
